<compile_context>
chip_gen: v5e
topology: v5e:2x2
jax: 0.10.0
libtpu: 0.0.40
codegen_flags: <defaults>
</compile_context>

<pallas_src>
import jax
import jax.numpy as jnp
from jax.experimental import pallas as pl
from jax.experimental.pallas import tpu as pltpu


def _round_up(n, m):
    return ((n + m - 1) // m) * m


def _mlp_kernel(x_ref, w1_ref, b1_ref, w2_ref, b2_ref, o_ref):
    # fc1 on the MXU: (TILE_B, in) @ (in, hidden) + (1, hidden), then ReLU.
    h = jnp.dot(x_ref[...], w1_ref[...], preferred_element_type=jnp.float32)
    h = jnp.maximum(h + b1_ref[...], 0.0)
    # fc2 on the VPU + XLU: elementwise multiply by the (1, hidden) weight row
    # and reduce over the lane axis -> (TILE_B, 1). Avoids an N=1 MXU matmul.
    o = jnp.sum(h * w2_ref[...], axis=-1, keepdims=True)
    # b2 is a scalar in SMEM -> scalar-broadcast add.
    o_ref[...] = o + b2_ref[0, 0]


def regression_net_forward(x, w1, b1, w2_row, b2, *, tile_b=512):
    """Forward pass of RegressionNet.

    x:      (B, in_features) float32
    w1:     (in_features, hidden) float32  (transpose of PyTorch fc1.weight)
    b1:     (1, hidden) float32
    w2_row: (1, hidden) float32            (PyTorch fc2.weight as-is)
    b2:     (1, 1) float32
    Returns (B, 1) float32.
    """
    x = x.astype(jnp.float32)
    B, in_features = x.shape
    hidden = w1.shape[1]
    assert w1.shape == (in_features, hidden)
    assert b1.shape == (1, hidden)
    assert w2_row.shape == (1, hidden)
    assert b2.shape == (1, 1)

    # TILE_B: large enough to approach the HBM roofline on big batches, but
    # never larger than the (sublane-rounded) batch. At in_features this small,
    # 512 rows x (in + 1) floats x 2 buffers is far under the 32 MiB scoped /
    # 64 MiB physical VMEM budget even on v7x.
    tile_b = min(tile_b, _round_up(B, 8))

    # Pad the batch so every grid step sees a full tile (last-tile correctness).
    b_pad = _round_up(B, tile_b)
    if b_pad != B:
        x = jnp.pad(x, ((0, b_pad - B), (0, 0)))

    grid = (b_pad // tile_b,)

    out = pl.pallas_call(
        _mlp_kernel,
        out_shape=jax.ShapeDtypeStruct((b_pad, 1), jnp.float32),
        grid=grid,
        in_specs=[
            # x: pipelined over the batch grid.
            pl.BlockSpec((tile_b, in_features), lambda i: (i, 0),
                         memory_space=pltpu.MemorySpace.VMEM),
            # Weights / biases: constant index_map -> resident in VMEM across
            # all grid steps (no re-DMA per step).
            pl.BlockSpec((in_features, hidden), lambda i: (0, 0),
                         memory_space=pltpu.MemorySpace.VMEM),
            pl.BlockSpec((1, hidden), lambda i: (0, 0),
                         memory_space=pltpu.MemorySpace.VMEM),
            pl.BlockSpec((1, hidden), lambda i: (0, 0),
                         memory_space=pltpu.MemorySpace.VMEM),
            # b2: single scalar -> SMEM, no VMEM tile / DMA descriptor.
            pl.BlockSpec(memory_space=pltpu.MemorySpace.SMEM),
        ],
        out_specs=pl.BlockSpec((tile_b, 1), lambda i: (i, 0),
                               memory_space=pltpu.MemorySpace.VMEM),
        compiler_params=pltpu.CompilerParams(
            dimension_semantics=("parallel",),
        ),
        # TODO(synk): for very large B / hidden, cast x & w1 to bf16 at this
        # boundary (keep f32 accumulation) and consider a lane-dense (B,)
        # output if the vst slot saturates.
    )(x, w1, b1, w2_row, b2)

    return out[:B]


def init_params(key, input_size=8, hidden_size=128):
    """Deterministic init matching nn.Linear shapes."""
    k1, k2, k3, k4 = jax.random.split(key, 4)
    bound1 = 1.0 / jnp.sqrt(input_size)
    bound2 = 1.0 / jnp.sqrt(hidden_size)
    # PyTorch fc1.weight is (hidden, in); we store its transpose (in, hidden).
    w1 = jax.random.uniform(k1, (input_size, hidden_size), jnp.float32,
                            -bound1, bound1)
    b1 = jax.random.uniform(k2, (1, hidden_size), jnp.float32, -bound1, bound1)
    # PyTorch fc2.weight is (1, hidden); keep that layout (used as a row).
    w2_row = jax.random.uniform(k3, (1, hidden_size), jnp.float32,
                                -bound2, bound2)
    b2 = jax.random.uniform(k4, (1, 1), jnp.float32, -bound2, bound2)
    return w1, b1, w2_row, b2


if __name__ == "__main__":
    key = jax.random.PRNGKey(0)
    k_x, k_p = jax.random.split(key)

    batch, input_size, hidden_size = 8, 8, 128
    x = jax.random.normal(k_x, (batch, input_size), jnp.float32)
    w1, b1, w2_row, b2 = init_params(k_p, input_size, hidden_size)

    out = regression_net_forward(x, w1, b1, w2_row, b2)
    jax.block_until_ready(out)

    # Reference check (plain JAX) to validate the kernel semantics.
    ref = jnp.maximum(x @ w1 + b1, 0.0) @ w2_row.T + b2
    assert out.shape == (batch, 1)
    assert jnp.allclose(out, ref, atol=1e-5, rtol=1e-5)

    print("KERNEL_OK")
</pallas_src>

<mosaic_0001>
module attributes {stable_mosaic.version = 11 : i64} {
  func.func @_mlp_kernel(%arg0: i32, %arg1: memref<8x8xf32, #tpu.memory_space<vmem>>, %arg2: memref<8x128xf32, #tpu.memory_space<vmem>>, %arg3: memref<1x128xf32, #tpu.memory_space<vmem>>, %arg4: memref<1x128xf32, #tpu.memory_space<vmem>>, %arg5: memref<1x1xf32, #tpu.memory_space<smem>>, %arg6: memref<8x1xf32, #tpu.memory_space<vmem>>) attributes {dimension_semantics = [#tpu.dimension_semantics<parallel>], iteration_bounds = array<i64: 1>, scalar_prefetch = 0 : i64, scratch_operands = 0 : i64, tpu.core_type = #tpu.core_type<tc>, window_params = [{transform_indices = @transform_0, window_bounds = array<i64: 8, 8>}, {pipeline_mode = #tpu.pipeline_mode<synchronous>, transform_indices = @transform_1, window_bounds = array<i64: 8, 128>}, {pipeline_mode = #tpu.pipeline_mode<synchronous>, transform_indices = @transform_2, window_bounds = array<i64: 1, 128>}, {pipeline_mode = #tpu.pipeline_mode<synchronous>, transform_indices = @transform_3, window_bounds = array<i64: 1, 128>}, {transform_indices = @transform_4, window_bounds = array<i64: 1, 1>}, {transform_indices = @transform_5, window_bounds = array<i64: 8, 1>}]} {
    %c0 = arith.constant 0 : index
    %c0_0 = arith.constant 0 : index
    %0 = vector.load %arg1[%c0, %c0_0] : memref<8x8xf32, #tpu.memory_space<vmem>>, vector<8x8xf32>
    %c0_1 = arith.constant 0 : index
    %c0_2 = arith.constant 0 : index
    %1 = vector.load %arg2[%c0_1, %c0_2] : memref<8x128xf32, #tpu.memory_space<vmem>>, vector<8x128xf32>
    %cst = arith.constant dense<0.000000e+00> : vector<8x128xf32>
    %2 = tpu.matmul %0, %1, %cst {dimension_numbers = #tpu.dot_dimension_numbers<[1], [0], [0], [1], [0, 0, 1, 1], [], []>} : vector<8x8xf32>, vector<8x128xf32>, vector<8x128xf32> -> vector<8x128xf32>
    %c0_3 = arith.constant 0 : index
    %c0_4 = arith.constant 0 : index
    %3 = vector.load %arg3[%c0_3, %c0_4] : memref<1x128xf32, #tpu.memory_space<vmem>>, vector<1x128xf32>
    %4 = vector.broadcast %3 : vector<1x128xf32> to vector<8x128xf32>
    %5 = arith.addf %2, %4 : vector<8x128xf32>
    %cst_5 = arith.constant 0.000000e+00 : f32
    %6 = vector.broadcast %cst_5 : f32 to vector<8x128xf32>
    %7 = arith.maximumf %5, %6 : vector<8x128xf32>
    %c0_6 = arith.constant 0 : index
    %c0_7 = arith.constant 0 : index
    %8 = vector.load %arg4[%c0_6, %c0_7] : memref<1x128xf32, #tpu.memory_space<vmem>>, vector<1x128xf32>
    %9 = vector.broadcast %8 : vector<1x128xf32> to vector<8x128xf32>
    %10 = arith.mulf %7, %9 : vector<8x128xf32>
    %cst_8 = arith.constant dense<0.000000e+00> : vector<8xf32>
    %11 = vector.multi_reduction <add>, %10, %cst_8 [1] : vector<8x128xf32> to vector<8xf32>
    %12 = vector.shape_cast %11 : vector<8xf32> to vector<8x1xf32>
    %c0_9 = arith.constant 0 : index
    %c0_10 = arith.constant 0 : index
    %13 = memref.load %arg5[%c0_9, %c0_10] : memref<1x1xf32, #tpu.memory_space<smem>>
    %14 = vector.broadcast %13 : f32 to vector<8x1xf32>
    %15 = arith.addf %12, %14 : vector<8x1xf32>
    %c0_11 = arith.constant 0 : index
    %c0_12 = arith.constant 0 : index
    %16 = vector.load %arg6[%c0_11, %c0_12] : memref<8x1xf32, #tpu.memory_space<vmem>>, vector<8x1xf32>
    tpu.vector_store %arg6[%c0_11, %c0_12], %15 {strides = array<i32>} : memref<8x1xf32, #tpu.memory_space<vmem>>, vector<8x1xf32>,
    return
  }
  func.func @transform_0(%arg0: i32) -> (i32, i32) {
    %c0_i32 = arith.constant 0 : i32
    %c0_i32_0 = arith.constant 0 : i32
    return %arg0, %c0_i32 : i32, i32
  }
  func.func @transform_1(%arg0: i32) -> (i32, i32) {
    %c0_i32 = arith.constant 0 : i32
    %c0_i32_0 = arith.constant 0 : i32
    %c0_i32_1 = arith.constant 0 : i32
    return %c0_i32, %c0_i32_0 : i32, i32
  }
  func.func @transform_2(%arg0: i32) -> (i32, i32) {
    %c0_i32 = arith.constant 0 : i32
    %c0_i32_0 = arith.constant 0 : i32
    %c0_i32_1 = arith.constant 0 : i32
    return %c0_i32, %c0_i32_0 : i32, i32
  }
  func.func @transform_3(%arg0: i32) -> (i32, i32) {
    %c0_i32 = arith.constant 0 : i32
    %c0_i32_0 = arith.constant 0 : i32
    %c0_i32_1 = arith.constant 0 : i32
    return %c0_i32, %c0_i32_0 : i32, i32
  }
  func.func @transform_4(%arg0: i32) -> (i32, i32) {
    %c0_i32 = arith.constant 0 : i32
    %c0_i32_0 = arith.constant 0 : i32
    %c0_i32_1 = arith.constant 0 : i32
    return %c0_i32, %c0_i32_0 : i32, i32
  }
  func.func @transform_5(%arg0: i32) -> (i32, i32) {
    %c0_i32 = arith.constant 0 : i32
    %c0_i32_0 = arith.constant 0 : i32
    return %arg0, %c0_i32 : i32, i32
  }
}

</mosaic_0001>

<bundles_post_ra>
// kernel: tpu_custom_call.1
= control target key start
LH: loop header
LB: loop body
LE: loop exit
PB: predicated region body
PF: predicated region fallthrough
CT: control target
= control target key end

     0   :  { %11 = vsyncpa [#allocation4], 0  ;;  %s205_s0 = inlined_call_operand.hbm [shape: f32[8,8], index: 0, kind: input, shape index: {}]   ;;  %s206_s1 = inlined_call_operand.hbm [shape: f32[8,128], index: 1, kind: input, shape index: {}]   ;;  %s207_s2 = inlined_call_operand.vmem [shape: f32[1,128], index: 2, kind: input, shape index: {}]   ;;  %s208_s3 = inlined_call_operand.vmem [shape: f32[1,128], index: 3, kind: input, shape index: {}]   ;;  %s209_s4 = inlined_call_operand.<no memory space> [shape: f32[1,1], index: 4, kind: input, shape index: {}]   ;;  %s210_s5 = inlined_call_operand.vmem [shape: f32[8,1], index: 5, kind: output, shape index: {}]  }
   0x1   :  { %s18_s20 = sshll.u32 %s205_s0, 4  ;;  %s19_s20 = int_to_ptr.hbm [resolvable:$true] %s18_s20 }
   0x2   :  { %12 = vsyncpa [#allocation6], 0  ;;  %s155_s21 = smov [#allocation3]   ;;  %s29_s25 = sshll.u32 %s206_s1, 4  ;;  %s30_s25 = int_to_ptr.hbm [resolvable:$true] %s29_s25 }
   0x3   :  { %s20_s22 = sshll.u32 %s155_s21, 4  ;;  %s156_s26 = smov [#allocation5]   ;;  %s21_s22 = int_to_ptr.vmem [resolvable:$true] %s20_s22 }
   0x4   :  { %23 = dma.hbm_to_vmem [thread:$0]  %s19_s20, 128, %s21_s22, [#allocation4]  }
   0x5   :  { %s31_s27 = sshll.u32 %s156_s26, 4  ;;  %s32_s27 = int_to_ptr.vmem [resolvable:$true] %s31_s27 }
   0x6   :  { %34 = dma.hbm_to_vmem [thread:$0]  %s30_s25, 128, %s32_s27, [#allocation6]  }
   0x7   :  { %151 = dma.done.wait [#allocation4], 128  }
   0x8   :  { %152 = vsyncadd [#allocation4], 4294967168 }
   0x9   :  { %153 = dma.done.wait [#allocation6], 128  }
   0xa   :  { %154 = vsyncadd [#allocation6], 4294967168  ;;  %vm55_vm0 = vcmask 64512   ;;  %v50_v0 = vld [vmem:[#allocation5] sm:$0xff]  ;;  %v49_v1 = vld [vmem:[#allocation3] sm:$0xff]  ;;  %v88_v8 = vstv %s209_s4  ;;  %vm90_vm1 = vcmask 7168  }
   0xb   :  { %74 = vmatpush.msra.mxu0 %v50_v0  ;;  %v101_v2 = vld [vmem:[%s207_s2] ss:$0 sm:$0xff] }
   0xc   :  { %98 = vmatmul.msk.f32.vlgmr.msra.gmra.mxu0 %vm55_vm0, %v49_v1  ;;  %v102_v5 = vld [vmem:[%s208_s3] ss:$0 sm:$0xff] }
  0x89   :  { %v76_v3 = vpop.f32.mrf.mxu0 }
  0x8a   :  { %v77_v4 = vadd.f32 %v101_v2, %v76_v3 }
  0x8c   :  { %v79_v6 = vmax.f32 %v77_v4, 0.0 }
  0x8e   :  { %v84_v7 = vmul.f32 %v102_v5, %v79_v6 }
  0x90   :  { %85 = vadd.xlane.f32.xlu0 %v84_v7 }
 0x103   :  { %v86_v9 = vpop.xlane.xlu0 %85 }
 0x104   :  { %v89_v10 = vadd.f32 %v88_v8, %v86_v9 }
 0x106   :  { %91 = vst.msk [vmem:[%s210_s5] sm:$0xff] %vm90_vm1, %v89_v10 }
 0x107   :  { %96 = vsyncpa [#allocation4], 1 }
 0x108   :  { %97 = vsyncpa [#allocation6], 1 }

</bundles_post_ra>
